<compile_context>
chip_gen: v6e
topology: v6e:2x2x1
jax: 0.10.0
libtpu: 0.0.40
codegen_flags: <defaults>
</compile_context>

<pallas_src>
import math
from functools import partial

import jax
import jax.numpy as jnp
from jax.experimental import pallas as pl
from jax.experimental.pallas import tpu as pltpu


def _tile(dim, target, align):
    """Largest tile <= target (halving) that evenly divides `dim` and stays
    >= `align`; falls back to the full dim (always a legal block)."""
    t = target
    while t >= align:
        if dim % t == 0:
            return t
        t //= 2
    return dim


# -------------------- linear (x @ w + b, optional activation) --------------------

def _linear_fullk_kernel(x_ref, w_ref, b_ref, o_ref, *, activation):
    # single K step: MXU matmul straight into the epilogue, no scratch / pl.when
    acc = jnp.dot(x_ref[...], w_ref[...], preferred_element_type=jnp.float32)
    acc = acc + b_ref[...]
    if activation == "gelu":        # exact (erf) GELU, as in BERT
        acc = 0.5 * acc * (1.0 + jax.lax.erf(acc * (1.0 / math.sqrt(2.0))))
    elif activation == "tanh":
        acc = jnp.tanh(acc)
    o_ref[...] = acc.astype(o_ref.dtype)


def _linear_ktiled_kernel(x_ref, w_ref, b_ref, o_ref, acc_ref, *, activation):
    @pl.when(pl.program_id(2) == 0)
    def _():
        acc_ref[...] = jnp.zeros_like(acc_ref)

    acc_ref[...] += jnp.dot(x_ref[...], w_ref[...],
                            preferred_element_type=jnp.float32)

    @pl.when(pl.program_id(2) == pl.num_programs(2) - 1)
    def _():
        acc = acc_ref[...] + b_ref[...]
        if activation == "gelu":
            acc = 0.5 * acc * (1.0 + jax.lax.erf(acc * (1.0 / math.sqrt(2.0))))
        elif activation == "tanh":
            acc = jnp.tanh(acc)
        o_ref[...] = acc.astype(o_ref.dtype)


def linear(x, w, b2d, activation=None, out_dtype=jnp.bfloat16,
           tm=128, tn=256, tk=512):
    """y = act(x @ w + b); x: [M, K] bf16, w: [K, N] bf16 (pre-cast once),
    b2d: [1, N] f32. f32 accumulation on the MXU, lane-dense output tiles."""
    M, K = x.shape
    N = w.shape[1]
    if x.dtype != jnp.bfloat16:
        x = x.astype(jnp.bfloat16)
    tm = _tile(M, tm, 8)      # sublane axis (capped at 128 for TC parallelism)
    tn = _tile(N, tn, 128)    # lane axis (multiple of 128 or full N)

    if K <= 4096:
        # Full-K: the (tm,K)+(K,tn) bf16 working set is small; M innermost so
        # each weight block is DMA'd exactly once per forward.
        grid = (N // tn, M // tm)
        return pl.pallas_call(
            partial(_linear_fullk_kernel, activation=activation),
            out_shape=jax.ShapeDtypeStruct((M, N), out_dtype),
            grid=grid,
            in_specs=[pl.BlockSpec((tm, K), lambda j, i: (i, 0)),
                      pl.BlockSpec((K, tn), lambda j, i: (0, j)),
                      pl.BlockSpec((1, tn), lambda j, i: (0, j))],
            out_specs=pl.BlockSpec((tm, tn), lambda j, i: (i, j)),
            compiler_params=pltpu.CompilerParams(
                dimension_semantics=("parallel", "parallel")),
        )(x, w, b2d)

    # Large-K fallback (not hit at BERT shapes): K as innermost 'arbitrary' axis.
    tk = _tile(K, tk, 128)
    grid = (M // tm, N // tn, K // tk)
    return pl.pallas_call(
        partial(_linear_ktiled_kernel, activation=activation),
        out_shape=jax.ShapeDtypeStruct((M, N), out_dtype),
        grid=grid,
        in_specs=[pl.BlockSpec((tm, tk), lambda i, j, k: (i, k)),
                  pl.BlockSpec((tk, tn), lambda i, j, k: (k, j)),
                  pl.BlockSpec((1, tn), lambda i, j, k: (0, j))],
        out_specs=pl.BlockSpec((tm, tn), lambda i, j, k: (i, j)),
        scratch_shapes=[pltpu.VMEM((tm, tn), jnp.float32)],
        compiler_params=pltpu.CompilerParams(
            dimension_semantics=("parallel", "parallel", "arbitrary")),
    )(x, w, b2d)


# -------------------- LayerNorm (optionally fused with residual add) ------------

def _layernorm_kernel(x_ref, g_ref, b_ref, o_ref, *, eps):
    x = x_ref[...].astype(jnp.float32)
    mu = jnp.mean(x, axis=-1, keepdims=True)
    var = jnp.mean(jnp.square(x - mu), axis=-1, keepdims=True)
    y = (x - mu) * jax.lax.rsqrt(var + eps)
    o_ref[...] = (y * g_ref[...] + b_ref[...]).astype(o_ref.dtype)


def _add_layernorm_kernel(x_ref, r_ref, g_ref, b_ref, o_ref, *, eps):
    # residual add fused into the LayerNorm (saves a full HBM pass)
    x = x_ref[...].astype(jnp.float32) + r_ref[...].astype(jnp.float32)
    mu = jnp.mean(x, axis=-1, keepdims=True)
    var = jnp.mean(jnp.square(x - mu), axis=-1, keepdims=True)
    y = (x - mu) * jax.lax.rsqrt(var + eps)
    o_ref[...] = (y * g_ref[...] + b_ref[...]).astype(o_ref.dtype)


def layernorm(x, gamma, beta, residual=None, eps=1e-12,
              out_dtype=jnp.bfloat16, tm=512):
    """LayerNorm over the last axis (optionally fused with a residual add)."""
    M, H = x.shape
    tm = _tile(M, tm, 8)
    grid = (M // tm,)
    g = gamma.reshape(1, H)
    b = beta.reshape(1, H)
    row_spec = pl.BlockSpec((tm, H), lambda i: (i, 0))
    vec_spec = pl.BlockSpec((1, H), lambda i: (0, 0))
    cp = pltpu.CompilerParams(dimension_semantics=("parallel",))
    if residual is None:
        return pl.pallas_call(
            partial(_layernorm_kernel, eps=eps),
            out_shape=jax.ShapeDtypeStruct((M, H), out_dtype),
            grid=grid,
            in_specs=[row_spec, vec_spec, vec_spec],
            out_specs=row_spec,
            compiler_params=cp,
        )(x, g, b)
    return pl.pallas_call(
        partial(_add_layernorm_kernel, eps=eps),
        out_shape=jax.ShapeDtypeStruct((M, H), out_dtype),
        grid=grid,
        in_specs=[row_spec, row_spec, vec_spec, vec_spec],
        out_specs=row_spec,
        compiler_params=cp,
    )(x, residual, g, b)


# -------------------- attention straight from the fused QKV tensor --------------

def _attention_kernel(q_ref, k_ref, v_ref, m_ref, o_ref, *,
                      scale, heads, dh, q_off, k_off, v_off):
    """Processes `heads` heads per grid step.
    q_ref/o_ref: [1, tq, W]; k_ref/v_ref: [1, S, W]; m_ref: [1, 1, S] additive."""
    m = m_ref[0]                                             # [1, S] f32
    outs = []
    for h in range(heads):                                   # static unroll
        q = q_ref[0, :, q_off + h * dh: q_off + (h + 1) * dh]  # [tq, dh] bf16
        k = k_ref[0, :, k_off + h * dh: k_off + (h + 1) * dh]  # [S,  dh] bf16
        v = v_ref[0, :, v_off + h * dh: v_off + (h + 1) * dh]  # [S,  dh] bf16
        # scores [tq, S] in f32 (contract on dh)
        s = jax.lax.dot_general(q, k, (((1,), (1,)), ((), ())),
                                preferred_element_type=jnp.float32) * scale
        s = s + m                                            # padding mask
        s = s - jnp.max(s, axis=-1, keepdims=True)
        p = jnp.exp(s)
        p = p * pl.reciprocal(jnp.sum(p, axis=-1, keepdims=True), approx=True)
        outs.append(jnp.dot(p.astype(v.dtype), v,
                            preferred_element_type=jnp.float32))
    ctx = outs[0] if len(outs) == 1 else jnp.concatenate(outs, axis=-1)
    o_ref[0] = ctx.astype(o_ref.dtype)          # one lane-dense full-width store


def attention(qkv, mask_add, n_heads, hidden):
    """qkv: [B, S, 3H] bf16 (fused Q|K|V projection); mask_add: [B, 1, S] f32.
    Returns context [B, S, H] bf16 in the usual head-concatenated layout."""
    B, S, threeH = qkv.shape
    H = hidden
    Dh = H // n_heads
    scale = 1.0 / math.sqrt(Dh)

    # smallest head group whose lane width is a multiple of 128 (BERT: 2 x 64)
    g = None
    for cand in range(1, n_heads + 1):
        if n_heads % cand == 0 and (cand * Dh) % 128 == 0:
            g = cand
            break

    if g is not None:
        W = g * Dh
        n_groups = n_heads // g
        tq = _tile(S, 128, 8)            # bound the f32 [tq, S] scores live set
        grid = (B, n_groups, S // tq)
        kern = partial(_attention_kernel, scale=scale, heads=g, dh=Dh,
                       q_off=0, k_off=0, v_off=0)
        # Q / K / V column blocks picked directly out of the fused qkv tensor.
        q_spec = pl.BlockSpec((1, tq, W), lambda b, gp, qi: (b, qi, gp))
        k_spec = pl.BlockSpec((1, S, W),
                              lambda b, gp, qi: (b, 0, n_groups + gp))
        v_spec = pl.BlockSpec((1, S, W),
                              lambda b, gp, qi: (b, 0, 2 * n_groups + gp))
        m_spec = pl.BlockSpec((1, 1, S), lambda b, gp, qi: (b, 0, 0))
        o_spec = pl.BlockSpec((1, tq, W), lambda b, gp, qi: (b, qi, gp))
        sem = ("parallel", "parallel", "parallel")
    else:
        # small / unaligned demo shapes: a single full-extent block per batch
        grid = (B,)
        kern = partial(_attention_kernel, scale=scale, heads=n_heads, dh=Dh,
                       q_off=0, k_off=H, v_off=2 * H)
        full_spec = pl.BlockSpec((1, S, threeH), lambda b: (b, 0, 0))
        q_spec = k_spec = v_spec = full_spec
        m_spec = pl.BlockSpec((1, 1, S), lambda b: (b, 0, 0))
        o_spec = pl.BlockSpec((1, S, H), lambda b: (b, 0, 0))
        sem = ("parallel",)

    return pl.pallas_call(
        kern,
        out_shape=jax.ShapeDtypeStruct((B, S, H), jnp.bfloat16),
        grid=grid,
        in_specs=[q_spec, k_spec, v_spec, m_spec],
        out_specs=o_spec,
        compiler_params=pltpu.CompilerParams(dimension_semantics=sem),
    )(qkv, qkv, qkv, mask_add)


# -------------------- parameters (deterministic, synthetic, pre-cast) -----------

def init_params(key, vocab_size, hidden, n_layers, intermediate,
                max_pos=64, type_vocab=2, init_range=0.02):
    keys = iter(jax.random.split(key, 16 + 16 * n_layers))

    def w(shape):   # bf16 weights, cast ONCE here (never per forward)
        return (init_range * jax.random.normal(next(keys), shape, jnp.float32)
                ).astype(jnp.bfloat16)

    def wf(shape):  # small f32 weights (classifier heads, plain-JAX path)
        return init_range * jax.random.normal(next(keys), shape, jnp.float32)

    def b(n):       # f32 bias pre-shaped [1, N] for the linear kernel
        return jnp.zeros((1, n), jnp.float32)

    params = {
        'word_emb': w((vocab_size, hidden)),
        'pos_emb': w((max_pos, hidden)),
        'type_emb': w((type_vocab, hidden)),
        'emb_ln_g': jnp.ones((hidden,), jnp.float32),
        'emb_ln_b': jnp.zeros((hidden,), jnp.float32),
        'pooler_w': w((hidden, hidden)), 'pooler_b': b(hidden),
        # classifier biases zero per _init_weights in the reference module
        'cls_oce_w': wf((hidden, 7)),    'cls_oce_b': jnp.zeros((7,), jnp.float32),
        'cls_ocnli_w': wf((hidden, 3)),  'cls_ocnli_b': jnp.zeros((3,), jnp.float32),
        'cls_tnews_w': wf((hidden, 15)), 'cls_tnews_b': jnp.zeros((15,), jnp.float32),
        'layers': [],
    }
    for _ in range(n_layers):
        qw, kw, vw = w((hidden, hidden)), w((hidden, hidden)), w((hidden, hidden))
        params['layers'].append({
            # Q/K/V fused into one [H, 3H] projection (single pallas_call/layer)
            'qkv_w': jnp.concatenate([qw, kw, vw], axis=1),
            'qkv_b': b(3 * hidden),
            'ao_w': w((hidden, hidden)), 'ao_b': b(hidden),
            'attn_ln_g': jnp.ones((hidden,), jnp.float32),
            'attn_ln_b': jnp.zeros((hidden,), jnp.float32),
            'ff1_w': w((hidden, intermediate)), 'ff1_b': b(intermediate),
            'ff2_w': w((intermediate, hidden)), 'ff2_b': b(hidden),
            'out_ln_g': jnp.ones((hidden,), jnp.float32),
            'out_ln_b': jnp.zeros((hidden,), jnp.float32),
        })
    return params


# -------------------- forward (mirrors bertForSequenceClassification.forward) ---

def bert_for_sequence_classification(params, token_ids, attention_masks,
                                     token_type_ids, task='oce', n_heads=4):
    assert task in ('oce', 'ocnli', 'tnews')
    B, S = token_ids.shape
    H = params['word_emb'].shape[1]

    # --- embeddings: bf16 gathers + adds (glue), then LayerNorm kernel ---
    x = (params['word_emb'][token_ids]
         + params['pos_emb'][jnp.arange(S)][None, :, :]
         + params['type_emb'][token_type_ids])
    x = layernorm(x.reshape(B * S, H), params['emb_ln_g'], params['emb_ln_b'])

    mask_add = ((1.0 - attention_masks.astype(jnp.float32)) * -10000.0
                ).reshape(B, 1, S)

    # --- transformer encoder layers ---
    for lp in params['layers']:
        qkv = linear(x, lp['qkv_w'], lp['qkv_b'])            # [B*S, 3H] bf16
        ctx = attention(qkv.reshape(B, S, 3 * H), mask_add, n_heads, H)
        a = linear(ctx.reshape(B * S, H), lp['ao_w'], lp['ao_b'])
        x = layernorm(a, lp['attn_ln_g'], lp['attn_ln_b'], residual=x)
        f = linear(x, lp['ff1_w'], lp['ff1_b'], activation='gelu')
        f = linear(f, lp['ff2_w'], lp['ff2_b'])
        x = layernorm(f, lp['out_ln_g'], lp['out_ln_b'], residual=x)

    # --- pooler: tanh(W * CLS + b)  (== bert_outputs[1]) ---
    cls = x.reshape(B, S, H)[:, 0, :]
    pooled = linear(cls, params['pooler_w'], params['pooler_b'],
                    activation='tanh', out_dtype=jnp.float32)
    # self.dropout(pooled_out) -> identity at inference

    # --- task classifier head (N = 7/3/15): plain JAX, a Pallas call is overhead
    if task == 'oce':
        w_c, b_c = params['cls_oce_w'], params['cls_oce_b']
    elif task == 'ocnli':
        w_c, b_c = params['cls_ocnli_w'], params['cls_ocnli_b']
    else:  # tnews
        w_c, b_c = params['cls_tnews_w'], params['cls_tnews_b']
    logits = pooled @ w_c + b_c

    # labels=None path of the reference forward: outputs = (logits,)
    return (logits,)


# -------------------- demo --------------------

if __name__ == "__main__":
    B, S, H = 2, 8, 32          # batch, seq_len, hidden_size
    n_layers, n_heads, inter = 2, 4, 64
    vocab = 100

    key = jax.random.PRNGKey(0)
    pkey, ikey = jax.random.split(key)
    params = init_params(pkey, vocab, H, n_layers, inter)

    token_ids = jax.random.randint(ikey, (B, S), 0, vocab, dtype=jnp.int32)
    attention_masks = jnp.ones((B, S), jnp.int32)
    token_type_ids = jnp.zeros((B, S), jnp.int32)

    (logits,) = bert_for_sequence_classification(
        params, token_ids, attention_masks, token_type_ids, task='oce')
    jax.block_until_ready(logits)
    assert logits.shape == (B, 7)
    print("KERNEL_OK")
</pallas_src>

<mosaic_0001>
module attributes {stable_mosaic.version = 11 : i64} {
  func.func @_layernorm_kernel(%arg0: i32, %arg1: memref<16x32xbf16, #tpu.memory_space<vmem>>, %arg2: memref<1x32xf32, #tpu.memory_space<vmem>>, %arg3: memref<1x32xf32, #tpu.memory_space<vmem>>, %arg4: memref<16x32xbf16, #tpu.memory_space<vmem>>) attributes {dimension_semantics = [#tpu.dimension_semantics<parallel>], iteration_bounds = array<i64: 1>, scalar_prefetch = 0 : i64, scratch_operands = 0 : i64, tpu.core_type = #tpu.core_type<tc>, window_params = [{transform_indices = @transform_0, window_bounds = array<i64: 16, 32>}, {pipeline_mode = #tpu.pipeline_mode<synchronous>, transform_indices = @transform_1, window_bounds = array<i64: 1, 32>}, {pipeline_mode = #tpu.pipeline_mode<synchronous>, transform_indices = @transform_2, window_bounds = array<i64: 1, 32>}, {transform_indices = @transform_3, window_bounds = array<i64: 16, 32>}]} {
    %c0 = arith.constant 0 : index
    %c0_0 = arith.constant 0 : index
    %0 = vector.load %arg1[%c0, %c0_0] : memref<16x32xbf16, #tpu.memory_space<vmem>>, vector<16x32xbf16>
    %1 = arith.extf %0 : vector<16x32xbf16> to vector<16x32xf32>
    %cst = arith.constant dense<0.000000e+00> : vector<16xf32>
    %2 = vector.multi_reduction <add>, %1, %cst [1] : vector<16x32xf32> to vector<16xf32>
    %3 = vector.shape_cast %2 : vector<16xf32> to vector<16x1xf32>
    %cst_1 = arith.constant 3.200000e+01 : f32
    %4 = vector.broadcast %cst_1 : f32 to vector<16x1xf32>
    %5 = arith.divf %3, %4 : vector<16x1xf32>
    %6 = vector.broadcast %5 : vector<16x1xf32> to vector<16x32xf32>
    %7 = arith.subf %1, %6 : vector<16x32xf32>
    %8 = arith.mulf %7, %7 : vector<16x32xf32>
    %cst_2 = arith.constant dense<0.000000e+00> : vector<16xf32>
    %9 = vector.multi_reduction <add>, %8, %cst_2 [1] : vector<16x32xf32> to vector<16xf32>
    %10 = vector.shape_cast %9 : vector<16xf32> to vector<16x1xf32>
    %cst_3 = arith.constant 3.200000e+01 : f32
    %11 = vector.broadcast %cst_3 : f32 to vector<16x1xf32>
    %12 = arith.divf %10, %11 : vector<16x1xf32>
    %13 = vector.broadcast %5 : vector<16x1xf32> to vector<16x32xf32>
    %14 = arith.subf %1, %13 : vector<16x32xf32>
    %cst_4 = arith.constant 9.99999996E-13 : f32
    %15 = vector.broadcast %cst_4 : f32 to vector<16x1xf32>
    %16 = arith.addf %12, %15 : vector<16x1xf32>
    %17 = math.rsqrt %16 : vector<16x1xf32>
    %18 = vector.broadcast %17 : vector<16x1xf32> to vector<16x32xf32>
    %19 = arith.mulf %14, %18 : vector<16x32xf32>
    %c0_5 = arith.constant 0 : index
    %c0_6 = arith.constant 0 : index
    %20 = vector.load %arg2[%c0_5, %c0_6] : memref<1x32xf32, #tpu.memory_space<vmem>>, vector<1x32xf32>
    %21 = vector.broadcast %20 : vector<1x32xf32> to vector<16x32xf32>
    %22 = arith.mulf %19, %21 : vector<16x32xf32>
    %c0_7 = arith.constant 0 : index
    %c0_8 = arith.constant 0 : index
    %23 = vector.load %arg3[%c0_7, %c0_8] : memref<1x32xf32, #tpu.memory_space<vmem>>, vector<1x32xf32>
    %24 = vector.broadcast %23 : vector<1x32xf32> to vector<16x32xf32>
    %25 = arith.addf %22, %24 : vector<16x32xf32>
    %26 = arith.truncf %25 : vector<16x32xf32> to vector<16x32xbf16>
    %c0_9 = arith.constant 0 : index
    %c0_10 = arith.constant 0 : index
    %27 = vector.load %arg4[%c0_9, %c0_10] : memref<16x32xbf16, #tpu.memory_space<vmem>>, vector<16x32xbf16>
    tpu.vector_store %arg4[%c0_9, %c0_10], %26 {strides = array<i32>} : memref<16x32xbf16, #tpu.memory_space<vmem>>, vector<16x32xbf16>,
    return
  }
  func.func @transform_0(%arg0: i32) -> (i32, i32) {
    %c0_i32 = arith.constant 0 : i32
    %c0_i32_0 = arith.constant 0 : i32
    return %arg0, %c0_i32 : i32, i32
  }
  func.func @transform_1(%arg0: i32) -> (i32, i32) {
    %c0_i32 = arith.constant 0 : i32
    %c0_i32_0 = arith.constant 0 : i32
    %c0_i32_1 = arith.constant 0 : i32
    return %c0_i32, %c0_i32_0 : i32, i32
  }
  func.func @transform_2(%arg0: i32) -> (i32, i32) {
    %c0_i32 = arith.constant 0 : i32
    %c0_i32_0 = arith.constant 0 : i32
    %c0_i32_1 = arith.constant 0 : i32
    return %c0_i32, %c0_i32_0 : i32, i32
  }
  func.func @transform_3(%arg0: i32) -> (i32, i32) {
    %c0_i32 = arith.constant 0 : i32
    %c0_i32_0 = arith.constant 0 : i32
    return %arg0, %c0_i32 : i32, i32
  }
}

</mosaic_0001>

<bundles_post_ra>
// kernel: tpu_custom_call.1
= control target key start
LH: loop header
LB: loop body
LE: loop exit
PB: predicated region body
PF: predicated region fallthrough
CT: control target
= control target key end

     0   :  { %8 = vsyncpa [#allocation3], 0  ;;  %s215_s0 = inlined_call_operand.hbm [shape: bf16[16,32], index: 0, kind: input, shape index: {}]   ;;  %s216_s1 = inlined_call_operand.vmem [shape: f32[1,32], index: 1, kind: input, shape index: {}]   ;;  %s217_s2 = inlined_call_operand.vmem [shape: f32[1,32], index: 2, kind: input, shape index: {}]   ;;  %s218_s3 = inlined_call_operand.hbm [shape: bf16[16,32], index: 3, kind: output, shape index: {}]  }
   0x1   :  { %9 = vsyncpa [#allocation4], 0  ;;  %s169_s12 = smov [#allocation2]  }
   0x2   :  { %s15_s13 = sshll.u32 %s169_s12, 4  ;;  %s16_s13 = int_to_ptr.vmem [resolvable:$true] %s15_s13 }
   0x3   :  { %s133_s14 = scalar_lea.vmem %s16_s13, 128  ;;  %p138_p1 = scmp.lt.s32.totalorder %s16_s13, %s16_s13 }
   0x4   :  { %p134_p0 = scmp.ne.s32.totalorder %s16_s13, %s133_s14  ;;  %p139_p2 = scmp.lt.s32.totalorder %s133_s14, %s133_s14 }
   0x6   :  { %p140_p3 = por %p139_p2, %p138_p1 }
   0x8   :  { %p141_p4 = pnand %p140_p3, %p134_p0 }
   0xa   :  { %144 = shalt.err (!%p141_p4)
}
   0xb   :  { %s170_s15 = smov 64   ;;  %s171_s16 = smov 4  }
   0xc   :  { %21 = dma.hbm_to_vmem [thread:$0]  %s215_s0, 128, %s16_s13, [#allocation3], %s170_s15, %s170_s15, %s171_s16  }
   0xd   :  { %165 = dma.done.wait [#allocation3], 128  }
   0xe   :  { %166 = vsyncadd [#allocation3], 4294967168  ;;  %v114_v0 = vld [vmem:[#allocation2] sm:$0xff]   ;;  %vm33_vm0 = vcmask 261120   ;;  %vm87_vm1 = vcmask 257024   ;;  %s172_s22 = smov [#allocation5]  }
   0xf   :  { %v115_v1 = vunpack.c.l.bf16 %v114_v0  ;;  %v116_v2 = vunpack.c.h.bf16 %v114_v0  ;;  %v107_v22 = vld [vmem:[%s216_s1] ss:$0 sm:$0xff]  ;;  %s95_s23 = sshll.u32 %s172_s22, 4  ;;  %s96_s23 = int_to_ptr.vmem [resolvable:$true] %s95_s23 }
  0x10   :  { %v108_v24 = vld [vmem:[%s217_s2] ss:$0 sm:$0xff]  ;;  %s145_s1 = scalar_lea.vmem %s96_s23, 128  ;;  %p150_p6 = scmp.lt.s32.totalorder %s96_s23, %s96_s23 }
  0x11   :  { %v34_v3 = vsel %vm33_vm0, %v115_v1, 0.0  ;;  %v37_v4 = vsel %vm33_vm0, %v116_v2, 0.0  ;;  %p146_p5 = scmp.ne.s32.totalorder %s96_s23, %s145_s1  ;;  %p151_p7 = scmp.lt.s32.totalorder %s145_s1, %s145_s1 }
  0x12   :  { %35 = vadd.xlane.f32.xlu0 %v34_v3 }
  0x13   :  { %p152_p8 = por %p151_p7, %p150_p6 }
  0x15   :  { %p153_p9 = pnand %p152_p8, %p146_p5 }
  0x16   :  { %38 = vadd.xlane.f32.xlu0 %v37_v4 }
  0x9b   :  { %v36_v5 = vpop.xlane.xlu0 %35 }
  0x9c   :  { %v41_v6 = vmul.f32 0.03125, %v36_v5 }
  0x9e   :  { %v43_v7 = vsub.f32 %v115_v1, %v41_v6 }
  0x9f   :  { %v39_v8 = vpop.xlane.xlu0 %38 }
  0xa0   :  { %v42_v9 = vmul.f32 0.03125, %v39_v8  ;;  %v45_v10 = vmul.f32 %v43_v7, %v43_v7 }
  0xa2   :  { %v44_v11 = vsub.f32 %v116_v2, %v42_v9  ;;  %v47_v12 = vsel %vm33_vm0, %v45_v10, 0.0 }
  0xa3   :  { %48 = vadd.xlane.f32.xlu1 %v47_v12 }
  0xa4   :  { %v46_v13 = vmul.f32 %v44_v11, %v44_v11 }
  0xa6   :  { %v50_v14 = vsel %vm33_vm0, %v46_v13, 0.0 }
  0xa7   :  { %51 = vadd.xlane.f32.xlu1 %v50_v14 }
 0x12c   :  { %v49_v15 = vpop.xlane.xlu1 %48 }
 0x12d   :  { %v53_v16 = vmul.f32 0.03125, %v49_v15 }
 0x12f   :  { %v55_v17 = vadd.f32 1e-12, %v53_v16 }
 0x130   :  { %v52_v18 = vpop.xlane.xlu1 %51 }
 0x131   :  { %121 = vrsqrt.f32 %v55_v17  ;;  %v54_v19 = vmul.f32 0.03125, %v52_v18 }
 0x133   :  { %v56_v20 = vadd.f32 1e-12, %v54_v19 }
 0x135   :  { %123 = vrsqrt.f32 %v56_v20 }
 0x13e   :  { %v122_v21 = vpop.eup %121 }
 0x13f   :  { %v59_v23 = vmul.f32 %v122_v21, %v43_v7 }
 0x141   :  { %v68_v25 = vmul.f32 %v107_v22, %v59_v23 }
 0x142   :  { %v124_v26 = vpop.eup %123 }
 0x143   :  { %v60_v27 = vmul.f32 %v124_v26, %v44_v11  ;;  %v77_v28 = vadd.f32 %v108_v24, %v68_v25 }
 0x145   :  { %v69_v29 = vmul.f32 %v107_v22, %v60_v27  ;;  %v111_v30 = vpack.c.bf16 %v77_v28, %v77_v28 }
 0x147   :  { %v78_v31 = vadd.f32 %v108_v24, %v69_v29  ;;  %88 = vst.msk [vmem:[#allocation5] sm:$0xf] %vm87_vm1, %v111_v30 }
 0x149   :  { %v112_v32 = vpack.c.bf16 %v78_v31, %v78_v31 }
 0x14b   :  { %89 = vst.msk [vmem:[#allocation5 + $0x4] sm:$0xf] %vm87_vm1, %v112_v32 }
 0x14c   :  { %156 = shalt.err (!%p153_p9)
}
 0x14d   :  { %101 = dma.vmem_to_hbm [thread:$0]  %s96_s23, 128, %s218_s3, [#allocation4], %s170_s15, %s170_s15, %s171_s16  }
 0x14e   :  { %167 = dma.done.wait [#allocation4], 128  }
 0x14f   :  { %168 = vsyncadd [#allocation4], 4294967168 }
 0x150   :  { %105 = vsyncpa [#allocation3], 1 }
 0x151   :  { %106 = vsyncpa [#allocation4], 1 }

</bundles_post_ra>
